<compile_context>
chip_gen: v5e
topology: v5e:2x2
jax: 0.10.0
libtpu: 0.0.40
codegen_flags: <defaults>
</compile_context>

<pallas_src>
import functools

import jax
import jax.numpy as jnp
from jax.experimental import pallas as pl
from jax.experimental.pallas import tpu as pltpu


def _round_up(x, m):
    return (x + m - 1) // m * m


def enet_head_kernel(x_ref, w_ref, o_ref, acc_ref, *, thw, hw_total, needs_mask):
    # x_ref:   (TB, THW, C)  feature chunk, channels-last (C on the 128-lane axis)
    # w_ref:   (C, NCp) f32  classifier weight^T, class dim padded, 1/HW folded in
    # o_ref:   (TB, NCp) f32 padded logits (bias added outside the kernel)
    # acc_ref: (TB, C)  f32  running spatial sum (VMEM scratch, resident per batch tile)
    hw = pl.program_id(1)

    @pl.when(hw == 0)
    def _init():
        acc_ref[...] = jnp.zeros_like(acc_ref)

    x = x_ref[...]
    if needs_mask:
        # The last spatial chunk may extend past the true HW extent; zero those
        # positions so the reduction stays exact (OOB input data is unspecified).
        pos = hw * thw + jax.lax.broadcasted_iota(jnp.int32, x.shape, dimension=1)
        x = jnp.where(pos < hw_total, x, jnp.zeros_like(x))

    # Global average pool == sum over spatial (sublane axis); f32 accumulation.
    acc_ref[...] += jnp.sum(x, axis=1, dtype=jnp.float32)

    @pl.when(hw == pl.num_programs(1) - 1)
    def _finalize():
        o_ref[...] = jnp.dot(
            acc_ref[...], w_ref[...], preferred_element_type=jnp.float32
        ).astype(o_ref.dtype)


def _vmem_capacity_bytes():
    """Per-core VMEM capacity; conservative (v7x-sized) fallback if unavailable."""
    try:
        cap = int(pltpu.get_tpu_info().vmem_capacity_bytes)
        if cap > 0:
            return cap
    except Exception:
        pass
    return 64 * 1024 * 1024


def _choose_tiles(B, HW, C, NCp, x_itemsize, budget_bytes):
    """Pick (batch tile, spatial tile) so all buffers fit the VMEM budget."""
    w_bytes = C * NCp * 4            # classifier weight (single-buffered)
    out_row = NCp * 4                # per batch row of the (double-buffered) output
    in_row = HW * C * x_itemsize     # per batch row of the features, full spatial

    # ---- batch tile --------------------------------------------------------
    avail = max(budget_bytes - w_bytes, 2 * (in_row + out_row))
    tb_fit = max(1, avail // (2 * (in_row + out_row)))
    if B <= 8:
        TB = B
    else:
        # Largest multiple-of-8 tile that fits, capped so there are always >=2
        # batch tiles: the "parallel" batch axis can then split across v7x's two
        # TensorCores (and a v6e-tuned tile is never blindly reused on v7x).
        TB = min(max(8, (tb_fit // 8) * 8),
                 _round_up(pl.cdiv(B, 2), 8),
                 _round_up(B, 8))
    n_batch = pl.cdiv(B, TB)

    # ---- spatial (reduction) tile ------------------------------------------
    acc_bytes = TB * C * 4
    row_bytes = TB * C * x_itemsize          # one spatial position across the tile
    in_budget = budget_bytes - w_bytes - 2 * TB * out_row - acc_bytes
    in_budget = max(in_budget, 2 * 8 * row_bytes)

    THW = HW
    if 2 * HW * row_bytes > in_budget:
        # Full spatial extent doesn't fit double-buffered -> shrink to fit.
        THW = max(8, (in_budget // (2 * row_bytes)) // 8 * 8)
    elif n_batch < 4 and HW >= 16:
        # Batch grid alone is too short to hide the DMA: split the reduction
        # axis so the DMA for chunk k+1 overlaps compute on chunk k.  Chunks are
        # kept >= ~1 MiB so the ~0.35us per-grid-step overhead stays amortized.
        min_thw = _round_up(pl.cdiv(1 << 20, max(row_bytes, 1)), 8)
        cand = max(8, min_thw, _round_up(pl.cdiv(HW, 4), 8))
        if cand < HW:
            THW = cand
    return TB, THW


def enet_forward(x_features, w, b, *, _tiles=None):
    """ENet.forward given the backbone feature map.

    Args:
      x_features: (B, H, W, C) feature map in NHWC (what a JAX EfficientNet
        backbone emits natively) -- the (B,H,W,C)->(B,HW,C) view is free, so no
        extra HBM pass.  Pass bf16 features if the backbone produces them; the
        kernel widens on load and accumulates in f32.
      w: (num_class, C) classifier weight (PyTorch nn.Linear layout).
      b: (num_class,)   classifier bias.
      _tiles: optional (TB, THW) override (testing / tuning only).

    Returns:
      (logits (B, num_class) f32, features (B, H, W, C)) -- mirrors (logits, x.detach()).
    """
    B, H, W, C = x_features.shape
    NC = w.shape[0]
    HW = H * W
    NCp = _round_up(NC, 128)                 # pad class dim to a full 128-lane width

    # Free view; C rides the 128-lane axis, spatial goes to sublanes.
    x_flat = x_features.reshape(B, HW, C)
    itemsize = jnp.dtype(x_flat.dtype).itemsize

    # Fold AdaptiveAvgPool's 1/HW into the tiny f32 classifier weight; pad classes.
    w_t = (jnp.transpose(w).astype(jnp.float32) / float(HW))   # (C, NC)
    w_t = jnp.pad(w_t, ((0, 0), (0, NCp - NC)))                # (C, NCp)

    # Generation-aware VMEM budget: ~96 MiB on 128 MiB chips (v5e/v6e), ~48 MiB on
    # v7x's 64 MiB per-TensorCore VMEM; leave headroom for compiler internals.
    cap = _vmem_capacity_bytes()
    vmem_limit = min(3 * cap // 4, 96 * 1024 * 1024)
    budget = vmem_limit - 4 * 1024 * 1024

    if _tiles is not None:
        TB, THW = _tiles
    else:
        TB, THW = _choose_tiles(B, HW, C, NCp, itemsize, budget)
    n_batch = pl.cdiv(B, TB)
    n_hw = pl.cdiv(HW, THW)
    needs_mask = (HW % THW) != 0

    cost = pl.CostEstimate(
        flops=2 * B * C * NCp + B * HW * C,
        transcendentals=0,
        bytes_accessed=B * HW * C * itemsize + C * NCp * 4 + B * NCp * 4,
    )

    kernel = functools.partial(
        enet_head_kernel, thw=THW, hw_total=HW, needs_mask=needs_mask)

    # Grid-invariant classifier weight: keep a single resident copy (no double
    # buffering) so the freed VMEM can go to a larger feature tile.
    try:
        w_spec = pl.BlockSpec((C, NCp), lambda i, hw: (0, 0),
                              pipeline_mode=pl.Buffered(1))
    except TypeError:  # older BlockSpec signature without pipeline_mode
        w_spec = pl.BlockSpec((C, NCp), lambda i, hw: (0, 0))

    logits_padded = pl.pallas_call(
        kernel,
        out_shape=jax.ShapeDtypeStruct((B, NCp), jnp.float32),
        grid_spec=pltpu.PrefetchScalarGridSpec(
            num_scalar_prefetch=0,
            grid=(n_batch, n_hw),
            in_specs=[
                pl.BlockSpec((TB, THW, C), lambda i, hw: (i, hw, 0)),
                w_spec,
            ],
            out_specs=pl.BlockSpec((TB, NCp), lambda i, hw: (i, 0)),
            scratch_shapes=[pltpu.VMEM((TB, C), jnp.float32)],
        ),
        compiler_params=pltpu.CompilerParams(
            dimension_semantics=("parallel", "arbitrary"),
            vmem_limit_bytes=int(vmem_limit),
        ),
        cost_estimate=cost,
    )(x_flat, w_t)

    # Slice off the lane padding and add the bias on the tiny (B, NC) result.
    logits = logits_padded[:, :NC] + b.astype(jnp.float32)[None, :]

    # x.detach() -> stop_gradient in JAX (no-op for values).
    return logits, jax.lax.stop_gradient(x_features)


if __name__ == "__main__":
    # Small, TPU-friendly shapes consistent with the module's forward:
    # batch=4, feadim (backbone channels)=128, 9x9 spatial features (EfficientNet
    # feature maps are small and odd-sized), num_class=16, bf16 features.
    B, H, W, C = 4, 9, 9, 128
    NUM_CLASS = 16

    key = jax.random.PRNGKey(0)
    kx, kw, kb = jax.random.split(key, 3)

    # Synthetic NHWC feature map (stand-in for extract_features output), bf16.
    x_features = jax.random.normal(kx, (B, H, W, C), dtype=jnp.float32
                                   ).astype(jnp.bfloat16)

    # Deterministic nn.Linear-style init: U(-1/sqrt(feadim), 1/sqrt(feadim)).
    bound = 1.0 / (C ** 0.5)
    w = jax.random.uniform(kw, (NUM_CLASS, C), minval=-bound, maxval=bound,
                           dtype=jnp.float32)
    b = jax.random.uniform(kb, (NUM_CLASS,), minval=-bound, maxval=bound,
                           dtype=jnp.float32)

    # Reference in plain JAX (f32), from the same bf16 features.
    xf = x_features.astype(jnp.float32)
    pooled_ref = jnp.mean(xf.reshape(B, H * W, C), axis=1)
    logits_ref = pooled_ref @ w.T + b

    # 1) Default (auto-chosen) tiling.
    logits, feats = enet_forward(x_features, w, b)
    logits = jax.block_until_ready(logits)
    feats = jax.block_until_ready(feats)
    assert logits.shape == (B, NUM_CLASS)
    assert feats.shape == (B, H, W, C)
    assert feats.dtype == x_features.dtype
    assert jnp.allclose(logits, logits_ref, atol=5e-3, rtol=5e-3)

    # 2) Forced multi-step spatial tiling (exercises the masked accumulation path
    #    that gives DMA<->compute overlap for small batches on real shapes).
    logits2, _ = enet_forward(x_features, w, b, _tiles=(B, 32))
    logits2 = jax.block_until_ready(logits2)
    assert jnp.allclose(logits2, logits_ref, atol=5e-3, rtol=5e-3)

    print("KERNEL_OK")
</pallas_src>

<mosaic_0001>
module attributes {stable_mosaic.version = 11 : i64} {
  func.func @enet_head_kernel(%arg0: i32, %arg1: i32, %arg2: memref<4x81x128xbf16, #tpu.memory_space<vmem>>, %arg3: memref<128x128xf32, #tpu.memory_space<vmem>>, %arg4: memref<4x128xf32, #tpu.memory_space<vmem>>, %arg5: memref<4x128xf32, #tpu.memory_space<vmem>>) attributes {dimension_semantics = [#tpu.dimension_semantics<parallel>, #tpu.dimension_semantics<arbitrary>], iteration_bounds = array<i64: 1, 1>, scalar_prefetch = 0 : i64, scratch_operands = 1 : i64, tpu.core_type = #tpu.core_type<tc>, window_params = [{transform_indices = @transform_0, window_bounds = array<i64: 4, 81, 128>}, {pipeline_mode = #tpu.pipeline_mode<synchronous>, transform_indices = @transform_1, window_bounds = array<i64: 128, 128>}, {transform_indices = @transform_2, window_bounds = array<i64: 4, 128>}]} {
    %c0_i32 = arith.constant 0 : i32
    %0 = arith.cmpi eq, %arg1, %c0_i32 : i32
    %1 = arith.extui %0 : i1 to i32
    %c0_i32_0 = arith.constant 0 : i32
    %2 = arith.cmpi ne, %1, %c0_i32_0 : i32
    scf.if %2 {
      %cst_9 = arith.constant 0.000000e+00 : f32
      %12 = vector.broadcast %cst_9 : f32 to vector<4x128xf32>
      %c0_10 = arith.constant 0 : index
      %c0_11 = arith.constant 0 : index
      %13 = vector.load %arg5[%c0_10, %c0_11] : memref<4x128xf32, #tpu.memory_space<vmem>>, vector<4x128xf32>
      tpu.vector_store %arg5[%c0_10, %c0_11], %12 {strides = array<i32>} : memref<4x128xf32, #tpu.memory_space<vmem>>, vector<4x128xf32>,
    } else {
    }
    %c0 = arith.constant 0 : index
    %c0_1 = arith.constant 0 : index
    %c0_2 = arith.constant 0 : index
    %3 = vector.load %arg2[%c0, %c0_1, %c0_2] : memref<4x81x128xbf16, #tpu.memory_space<vmem>>, vector<4x81x128xbf16>
    %c0_3 = arith.constant 0 : index
    %c0_4 = arith.constant 0 : index
    %4 = vector.load %arg5[%c0_3, %c0_4] : memref<4x128xf32, #tpu.memory_space<vmem>>, vector<4x128xf32>
    %5 = arith.extf %3 : vector<4x81x128xbf16> to vector<4x81x128xf32>
    %cst = arith.constant dense<0.000000e+00> : vector<4x128xf32>
    %6 = vector.multi_reduction <add>, %5, %cst [1] : vector<4x81x128xf32> to vector<4x128xf32>
    %7 = arith.addf %4, %6 : vector<4x128xf32>
    %c0_5 = arith.constant 0 : index
    %c0_6 = arith.constant 0 : index
    %8 = vector.load %arg5[%c0_5, %c0_6] : memref<4x128xf32, #tpu.memory_space<vmem>>, vector<4x128xf32>
    tpu.vector_store %arg5[%c0_5, %c0_6], %7 {strides = array<i32>} : memref<4x128xf32, #tpu.memory_space<vmem>>, vector<4x128xf32>,
    %c0_i32_7 = arith.constant 0 : i32
    %9 = arith.cmpi eq, %arg1, %c0_i32_7 : i32
    %10 = arith.extui %9 : i1 to i32
    %c0_i32_8 = arith.constant 0 : i32
    %11 = arith.cmpi ne, %10, %c0_i32_8 : i32
    scf.if %11 {
      %c0_9 = arith.constant 0 : index
      %c0_10 = arith.constant 0 : index
      %12 = vector.load %arg5[%c0_9, %c0_10] : memref<4x128xf32, #tpu.memory_space<vmem>>, vector<4x128xf32>
      %c0_11 = arith.constant 0 : index
      %c0_12 = arith.constant 0 : index
      %13 = vector.load %arg3[%c0_11, %c0_12] : memref<128x128xf32, #tpu.memory_space<vmem>>, vector<128x128xf32>
      %cst_13 = arith.constant dense<0.000000e+00> : vector<4x128xf32>
      %14 = tpu.matmul %12, %13, %cst_13 {dimension_numbers = #tpu.dot_dimension_numbers<[1], [0], [0], [1], [0, 0, 1, 1], [], []>} : vector<4x128xf32>, vector<128x128xf32>, vector<4x128xf32> -> vector<4x128xf32>
      %c0_14 = arith.constant 0 : index
      %c0_15 = arith.constant 0 : index
      %15 = vector.load %arg4[%c0_14, %c0_15] : memref<4x128xf32, #tpu.memory_space<vmem>>, vector<4x128xf32>
      tpu.vector_store %arg4[%c0_14, %c0_15], %14 {strides = array<i32>} : memref<4x128xf32, #tpu.memory_space<vmem>>, vector<4x128xf32>,
    } else {
    }
    return
  }
  func.func @transform_0(%arg0: i32, %arg1: i32) -> (i32, i32, i32) {
    %c0_i32 = arith.constant 0 : i32
    %c0_i32_0 = arith.constant 0 : i32
    return %arg0, %arg1, %c0_i32 : i32, i32, i32
  }
  func.func @transform_1(%arg0: i32, %arg1: i32) -> (i32, i32) {
    %c0_i32 = arith.constant 0 : i32
    %c0_i32_0 = arith.constant 0 : i32
    %c0_i32_1 = arith.constant 0 : i32
    return %c0_i32, %c0_i32_0 : i32, i32
  }
  func.func @transform_2(%arg0: i32, %arg1: i32) -> (i32, i32) {
    %c0_i32 = arith.constant 0 : i32
    %c0_i32_0 = arith.constant 0 : i32
    return %arg0, %c0_i32 : i32, i32
  }
}

</mosaic_0001>

<bundles_post_ra>
// kernel: tpu_custom_call.1
= control target key start
LH: loop header
LB: loop body
LE: loop exit
PB: predicated region body
PF: predicated region fallthrough
CT: control target
= control target key end

     0   :  { %v362_v2 = vmov 0.0   ;;  %s542_s0 = inlined_call_operand.vmem [shape: bf16[4,81,128], index: 0, kind: input, shape index: {}]   ;;  %s543_s1 = inlined_call_operand.vmem [shape: f32[128,128], index: 1, kind: input, shape index: {}]   ;;  %s544_s2 = inlined_call_operand.hbm [shape: f32[4,128], index: 2, kind: output, shape index: {}]  }
   0x1   :  { %v207_v0 = vld [vmem:[%s543_s1 + $0x78] sm:$0xff]  ;;  %v206_v1 = vld [vmem:[%s543_s1 + $0x70] sm:$0xff]  ;;  %16 = vst [vmem:[#allocation2] sm:$0xf] %v362_v2  ;;  %v205_v3 = vld [vmem:[%s543_s1 + $0x68] sm:$0xff] }
   0x2   :  { %208 = vmatpush.msra.mxu0 %v207_v0  ;;  %v204_v4 = vld [vmem:[%s543_s1 + $0x60] sm:$0xff]  ;;  %v203_v5 = vld [vmem:[%s543_s1 + $0x58] sm:$0xff]  ;;  %v202_v6 = vld [vmem:[%s543_s1 + $0x50] sm:$0xff] }
   0x3   :  { %v201_v7 = vld [vmem:[%s543_s1 + $0x48] sm:$0xff]  ;;  %v246_v8 = vld [vmem:[%s542_s0] sm:$0xff]   ;;  %v321_v10 = vld [vmem:[%s542_s0 + $0x30] sm:$0xff]  }
   0x4   :  { %209 = vmatpush.msra.mxu0 %v206_v1  ;;  %v406_v9 = vld [vmem:[%s542_s0 + $0x8] sm:$0xff]   ;;  %v200_v11 = vld [vmem:[%s543_s1 + $0x40] sm:$0xff]  ;;  %v325_v12 = vld [vmem:[%s542_s0 + $0x58] sm:$0xff]   ;;  %v247_v16 = vunpack.c.l.bf16 %v246_v8  ;;  %v248_v17 = vunpack.c.h.bf16 %v246_v8  ;;  %v267_v20 = vunpack.c.l.bf16 %v321_v10 }
   0x5   :  { %v420_v13 = vld [vmem:[%s542_s0 + $0x10] sm:$0xff]   ;;  %v28_v14 = vld [vmem:[%s542_s0 + $0x2c] sm:$0xf]  ;;  %v251_v18 = vunpack.c.l.bf16 %v406_v9  ;;  %v432_v19 = vld [vmem:[%s542_s0 + $0x18] sm:$0xff]   ;;  %v252_v24 = vunpack.c.h.bf16 %v406_v9  ;;  %v283_v26 = vunpack.c.l.bf16 %v325_v12  ;;  %v284_v27 = vunpack.c.h.bf16 %v325_v12 }
   0x6   :  { %210 = vmatpush.msra.mxu0 %v205_v3  ;;  %v330_v15 = vld [vmem:[%s542_s0 + $0x88] sm:$0xff]   ;;  %v326_v21 = vld [vmem:[%s542_s0 + $0x60] sm:$0xff]   ;;  %v199_v23 = vld [vmem:[%s543_s1 + $0x38] sm:$0xff] }
   0x7   :  { %v50_v22 = vld [vmem:[%s542_s0 + $0x84] sm:$0xf]  ;;  %v322_v25 = vld [vmem:[%s542_s0 + $0x38] sm:$0xff]   ;;  %v303_v28 = vunpack.c.l.bf16 %v330_v15 }
   0x8   :  { %211 = vmatpush.msra.mxu0 %v204_v4 }
   0xa   :  { %212 = vmatpush.msra.mxu0 %v203_v5 }
   0xc   :  { %213 = vmatpush.msra.mxu0 %v202_v6 }
   0xe   :  { %214 = vmatpush.msra.mxu0 %v201_v7 }
   0xf   :  { %7 = vsyncpa [#allocation4], 0  ;;  %v255_v29 = vunpack.c.l.bf16 %v420_v13  ;;  %v256_v30 = vunpack.c.h.bf16 %v420_v13  ;;  %v268_v31 = vunpack.c.h.bf16 %v321_v10  ;;  %v331_v32 = vld [vmem:[%s542_s0 + $0x90] sm:$0xff]   ;;  %v73_v33 = vunpack.c.l.bf16 %v28_v14  ;;  %v459_v36 = vld [vmem:[%s542_s0 + $0x20] sm:$0xff]   ;;  %s236_s11 = sshll.u32 %s544_s2, 4  ;;  %s237_s11 = int_to_ptr.hbm [resolvable:$true] %s236_s11 }
  0x10   :  { %215 = vmatpush.msra.mxu0 %v200_v11  ;;  %v198_v34 = vld [vmem:[%s543_s1 + $0x30] sm:$0xff]  ;;  %v259_v35 = vunpack.c.l.bf16 %v432_v19  ;;  %v287_v37 = vunpack.c.l.bf16 %v326_v21  ;;  %v304_v38 = vunpack.c.h.bf16 %v330_v15  ;;  %v95_v39 = vunpack.c.l.bf16 %v50_v22  ;;  %v327_v42 = vld [vmem:[%s542_s0 + $0x68] sm:$0xff]   ;;  %v323_v46 = vld [vmem:[%s542_s0 + $0x40] sm:$0xff]  }
  0x11   :  { %v260_v40 = vunpack.c.h.bf16 %v432_v19  ;;  %v271_v41 = vunpack.c.l.bf16 %v322_v25  ;;  %v106_v43 = vadd.f32 %v248_v17, %v247_v16  ;;  %v124_v44 = vadd.f32 %v267_v20, %v73_v33  ;;  %v197_v45 = vld [vmem:[%s543_s1 + $0x28] sm:$0xff]  ;;  %v332_v53 = vld [vmem:[%s542_s0 + $0x98] sm:$0xff]   ;;  %v196_v56 = vld [vmem:[%s543_s1 + $0x20] sm:$0xff] }
  0x12   :  { %216 = vmatpush.msra.mxu0 %v199_v23  ;;  %v288_v47 = vunpack.c.h.bf16 %v326_v21  ;;  %v307_v48 = vunpack.c.l.bf16 %v331_v32  ;;  %v141_v49 = vadd.f32 %v284_v27, %v283_v26  ;;  %v158_v50 = vadd.f32 %v303_v28, %v95_v39  ;;  %v481_v57 = vld [vmem:[%s542_s0 + $0x48] sm:$0xff]   ;;  %v328_v0 = vld [vmem:[%s542_s0 + $0x70] sm:$0xff]   ;;  %v195_v3 = vld [vmem:[%s543_s1 + $0x18] sm:$0xff] }
  0x13   :  { %v263_v51 = vunpack.c.l.bf16 %v459_v36  ;;  %v272_v52 = vunpack.c.h.bf16 %v322_v25  ;;  %v107_v54 = vadd.f32 %v251_v18, %v106_v43  ;;  %v125_v55 = vadd.f32 %v268_v31, %v124_v44  ;;  %v329_v10 = vld [vmem:[%s542_s0 + $0x78] sm:$0xff]   ;;  %v333_v11 = vld [vmem:[%s542_s0 + $0xa0] sm:$0xff]   ;;  %v194_v15 = vld [vmem:[%s543_s1 + $0x10] sm:$0xff] }
  0x14   :  { %217 = vmatpush.msra.mxu0 %v198_v34  ;;  %v291_v58 = vunpack.c.l.bf16 %v327_v42  ;;  %v308_v59 = vunpack.c.h.bf16 %v331_v32  ;;  %v142_v60 = vadd.f32 %v287_v37, %v141_v49  ;;  %v159_v61 = vadd.f32 %v304_v38, %v158_v50  ;;  %v27_v16 = vld [vmem:[%s542_s0 + $0x28] sm:$0x1]  ;;  %v37_v23 = vld [vmem:[%s542_s0 + $0x50] sm:$0xf]  ;;  %v49_v31 = vld [vmem:[%s542_s0 + $0x80] sm:$0x1] }
  0x15   :  { %v264_v62 = vunpack.c.h.bf16 %v459_v36  ;;  %v275_v63 = vunpack.c.l.bf16 %v323_v46  ;;  %v108_v1 = vadd.f32 %v252_v24, %v107_v54  ;;  %vm115_vm0 = vcmask 1040384   ;;  %v38_v24 = vld [vmem:[%s542_s0 + $0x54] sm:$0x1]  ;;  %v193_v28 = vld [vmem:[%s543_s1 + $0x8] sm:$0xff] }
  0x16   :  { %218 = vmatpush.msra.mxu0 %v197_v45  ;;  %v126_v2 = vadd.f32 %v271_v41, %v125_v55  ;;  %v292_v4 = vunpack.c.h.bf16 %v327_v42  ;;  %v311_v5 = vunpack.c.l.bf16 %v332_v53  ;;  %v143_v6 = vadd.f32 %v288_v47, %v142_v60  ;;  %v60_v33 = vld [vmem:[%s542_s0 + $0xac] sm:$0x1]  ;;  %v192_v42 = vld [vmem:[%s543_s1] sm:$0xff] }
  0x17   :  { %v160_v7 = vadd.f32 %v307_v48, %v159_v61  ;;  %v276_v8 = vunpack.c.h.bf16 %v323_v46  ;;  %v279_v9 = vunpack.c.l.bf16 %v481_v57  ;;  %v109_v12 = vadd.f32 %v255_v29, %v108_v1 }
  0x18   :  { %219 = vmatpush.msra.mxu0 %v196_v56  ;;  %v127_v14 = vadd.f32 %v272_v52, %v126_v2  ;;  %v295_v17 = vunpack.c.l.bf16 %v328_v0  ;;  %v312_v18 = vunpack.c.h.bf16 %v332_v53  ;;  %v144_v20 = vadd.f32 %v291_v58, %v143_v6 }
  0x19   :  { %v161_v21 = vadd.f32 %v308_v59, %v160_v7  ;;  %v280_v22 = vunpack.c.h.bf16 %v481_v57  ;;  %v296_v25 = vunpack.c.h.bf16 %v328_v0  ;;  %v110_v26 = vadd.f32 %v256_v30, %v109_v12  ;;  %v59_v30 = vld [vmem:[%s542_s0 + $0xa8] sm:$0xf]  ;;  %s363_s0 = smov [#allocation3]  }
  0x1a   :  { %220 = vmatpush.msra.mxu0 %v195_v3  ;;  %v128_v27 = vadd.f32 %v275_v63, %v127_v14  ;;  %v299_v29 = vunpack.c.l.bf16 %v329_v10  ;;  %v315_v32 = vunpack.c.l.bf16 %v333_v11  ;;  %v145_v34 = vadd.f32 %v292_v4, %v144_v20  ;;  %s234_s1 = sshll.u32 %s363_s0, 4  ;;  %s235_s1 = int_to_ptr.vmem [resolvable:$true] %s234_s1 }
  0x1b   :  { %v162_v37 = vadd.f32 %v311_v5, %v161_v21  ;;  %v316_v13 = vunpack.c.h.bf16 %v333_v11  ;;  %v72_v38 = vunpack.c.l.bf16 %v27_v16  ;;  %v111_v39 = vadd.f32 %v259_v35, %v110_v26 }
  0x1c   :  { %221 = vmatpush.msra.mxu0 %v194_v15  ;;  %v129_v41 = vadd.f32 %v276_v8, %v128_v27  ;;  %v82_v43 = vunpack.c.l.bf16 %v37_v23  ;;  %v83_v44 = vunpack.c.l.bf16 %v38_v24  ;;  %v146_v45 = vadd.f32 %v295_v17, %v145_v34 }
  0x1d   :  { %v163_v46 = vadd.f32 %v312_v18, %v162_v37  ;;  %v94_v47 = vunpack.c.l.bf16 %v49_v31  ;;  %v105_v48 = vunpack.c.l.bf16 %v60_v33  ;;  %v112_v49 = vadd.f32 %v260_v40, %v111_v39 }
  0x1e   :  { %222 = vmatpush.msra.mxu0 %v193_v28  ;;  %v130_v50 = vadd.f32 %v279_v9, %v129_v41  ;;  %v300_v52 = vunpack.c.h.bf16 %v329_v10  ;;  %v104_v53 = vunpack.c.l.bf16 %v59_v30  ;;  %v147_v54 = vadd.f32 %v296_v25, %v146_v45 }
  0x1f   :  { %v164_v35 = vadd.f32 %v315_v32, %v163_v46  ;;  %v113_v55 = vadd.f32 %v263_v51, %v112_v49  ;;  %v116_v57 = vsel %vm115_vm0, %v72_v38, 0.0  ;;  %v133_v58 = vsel %vm115_vm0, %v83_v44, 0.0 }
  0x20   :  { %223 = vmatpush.msra.mxu0 %v192_v42  ;;  %v131_v56 = vadd.f32 %v280_v22, %v130_v50  ;;  %v148_v59 = vadd.f32 %v299_v29, %v147_v54  ;;  %v150_v61 = vsel %vm115_vm0, %v94_v47, 0.0  ;;  %v167_v63 = vsel %vm115_vm0, %v105_v48, 0.0  ;;  %v61_v29 = vld [vmem:[#allocation2] sm:$0xf] }
  0x21   :  { %v165_v60 = vadd.f32 %v316_v13, %v164_v35  ;;  %v114_v19 = vadd.f32 %v264_v62, %v113_v55  ;;  %vm179_vm1 = vcmask 1041409   ;;  %vm181_vm2 = vcmask 1042434  }
  0x22   :  { %v132_v40 = vadd.f32 %v131_v56, %v82_v43  ;;  %v149_v0 = vadd.f32 %v300_v52, %v148_v59  ;;  %vm183_vm3 = vcmask 1043459  }
  0x23   :  { %v166_v1 = vadd.f32 %v165_v60, %v104_v53  ;;  %v117_v2 = vadd.f32 %v116_v57, %v114_v19 }
  0x24   :  { %v134_v3 = vadd.f32 %v133_v58, %v132_v40  ;;  %v151_v51 = vadd.f32 %v150_v61, %v149_v0 }
  0x25   :  { %v168_v4 = vadd.f32 %v167_v63, %v166_v1  ;;  %v118_v5 = vrot.slane %v117_v2, 4 }
  0x26   :  { %v135_v6 = vrot.slane %v134_v3, 4  ;;  %v152_v7 = vrot.slane %v151_v51, 4 }
  0x27   :  { %v169_v8 = vrot.slane %v168_v4, 4  ;;  %v119_v9 = vadd.f32 %v118_v5, %v117_v2 }
  0x28   :  { %v136_v10 = vadd.f32 %v135_v6, %v134_v3  ;;  %v153_v11 = vadd.f32 %v152_v7, %v151_v51 }
  0x29   :  { %v170_v36 = vadd.f32 %v169_v8, %v168_v4  ;;  %v120_v62 = vrot.slane %v119_v9, 2 }
  0x2a   :  { %v137_v12 = vrot.slane %v136_v10, 2  ;;  %v154_v14 = vrot.slane %v153_v11, 2 }
  0x2b   :  { %v171_v15 = vrot.slane %v170_v36, 2  ;;  %v121_v16 = vadd.f32 %v120_v62, %v119_v9 }
  0x2c   :  { %v138_v17 = vadd.f32 %v137_v12, %v136_v10  ;;  %v155_v18 = vadd.f32 %v154_v14, %v153_v11 }
  0x2d   :  { %v172_v20 = vadd.f32 %v171_v15, %v170_v36  ;;  %v122_v21 = vrot.slane %v121_v16, 1 }
  0x2e   :  { %v139_v22 = vrot.slane %v138_v17, 1  ;;  %v156_v23 = vrot.slane %v155_v18, 1 }
  0x2f   :  { %v173_v24 = vrot.slane %v172_v20, 1  ;;  %v123_v25 = vadd.f32 %v122_v21, %v121_v16 }
  0x30   :  { %v140_v26 = vadd.f32 %v139_v22, %v138_v17  ;;  %v157_v27 = vadd.f32 %v156_v23, %v155_v18 }
  0x31   :  { %v174_v28 = vadd.f32 %v173_v24, %v172_v20 }
  0x32   :  { %v180_v31 = vsel %vm179_vm1, %v140_v26, %v123_v25 }
  0x33   :  { %v182_v32 = vsel %vm181_vm2, %v157_v27, %v180_v31 }
  0x34   :  { %v184_v33 = vsel %vm183_vm3, %v174_v28, %v182_v32 }
  0x35   :  { %v186_v34 = vadd.f32 %v184_v33, %v61_v29 }
  0x37   :  { %187 = vst [vmem:[#allocation2] sm:$0xf] %v186_v34 }
  0x3e   :  { %v191_v37 = vld [vmem:[#allocation2] sm:$0xf] }
  0x3f   :  { %224 = vmatmul.f32.vlgmr.msra.gmra.mxu0 %v191_v37 }
  0xbc   :  { %v225_v13 = vpop.f32.mrf.mxu0 }
  0xbd   :  { %228 = vst [vmem:[#allocation3] sm:$0xf] %v225_v13 }
  0xbe   :  { %239 = dma.vmem_to_hbm [thread:$0]  %s235_s1, 64, %s237_s11, [#allocation4]  }
  0xbf   :  { %360 = dma.done.wait [#allocation4], 64  }
  0xc0   :  { %361 = vsyncadd [#allocation4], 4294967232 }
  0xc1   :  { %244 = vsyncpa [#allocation4], 1 }

</bundles_post_ra>
